<compile_context>
chip_gen: v5e
topology: v5e:2x2
jax: 0.10.0
libtpu: 0.0.40
codegen_flags: <defaults>
</compile_context>

<pallas_src>
import functools

import jax
import jax.numpy as jnp
from jax import lax
from jax.experimental import pallas as pl
from jax.experimental.pallas import tpu as pltpu


_LANE = 256                     # preferred lane-dense last dim (multiple of 128)
_MAX_BLOCK_ELEMS = 512 * 1024   # ~2 MiB of f32 per input block per buffer


def _round_up(a, b):
    return ((a + b - 1) // b) * b


def _default_num_parts():
    # 2 TensorCores per chip only on v7x-class parts; elsewhere the leading
    # "parallel" grid axis is just a serial loop, so keep it at 1.
    try:
        kind = jax.devices()[0].device_kind.lower()
    except Exception:
        return 1
    return 2 if ("v7" in kind or "7x" in kind) else 1


def _binary_log_loss_kernel(x_ref, y_ref, o_ref, *, tile_rows, lane,
                            tiles_per_part, rows, has_tail):
    i = pl.program_id(0)
    j = pl.program_id(1)

    @pl.when(j == 0)
    def _():
        o_ref[...] = jnp.zeros_like(o_ref)

    x = x_ref[...].astype(jnp.float32)
    y = y_ref[...].astype(jnp.float32)

    # Stable BCE-with-logits: max(x,0) - x*y + log1p(exp(-|x|))
    # (exp argument is always <= 0 -> no overflow).
    loss = jnp.maximum(x, 0.0) - x * y + jnp.log1p(jnp.exp(-jnp.abs(x)))

    def accumulate(vals):
        # Pure-VPU partial-sum accumulation into the resident (8, lane) output
        # tile; the reshape only splits the sublane-major axis (layout-free).
        o_ref[...] += vals.reshape(tile_rows // 8, 8, lane).sum(axis=0)

    if has_tail:
        # Partial (or fully out-of-bounds) tiles are only possible on the last
        # step(s); the hot path below does zero masking work.
        rows_remaining = rows - (i * tiles_per_part + j) * tile_rows
        is_full = rows_remaining >= tile_rows

        @pl.when(is_full)
        def _():
            accumulate(loss)

        @pl.when(jnp.logical_not(is_full))
        def _():
            r = lax.broadcasted_iota(jnp.int32, (tile_rows, lane), 0)
            accumulate(jnp.where(r < rows_remaining, loss, 0.0))
    else:
        accumulate(loss)


def binary_log_loss(out_prod, y_s, *, tile_rows=1024, num_parts=None):
    """Pallas implementation of BinaryLogLoss.forward. Returns a scalar f32."""
    n = out_prod.size
    if n == 0:
        return jnp.float32(jnp.nan)
    if num_parts is None:
        num_parts = _default_num_parts()

    # Build a free 2-D (rows, lane) view of the contiguous input — no padding,
    # no copies, no wrapper-side casts (both would add full extra HBM passes).
    if n % _LANE == 0:
        lane = _LANE
        rows = n // lane
        x2 = out_prod.reshape(rows, lane)
        y2 = y_s.reshape(rows, lane)
    elif out_prod.ndim >= 2:
        lane = out_prod.shape[-1]
        rows = n // lane
        x2 = out_prod.reshape(rows, lane)
        y2 = y_s.reshape(rows, lane)
    else:
        # Rare fallback: 1-D/0-D input whose length doesn't divide the lane
        # width. The pad value makes padded elements contribute exactly 0 loss
        # (x << 0, y = 0). Only this path copies the (small) input.
        lane = _LANE
        pad = (-n) % lane
        x_flat = jnp.pad(out_prod.reshape(-1).astype(jnp.float32), (0, pad),
                         constant_values=-1e9)
        y_flat = jnp.pad(y_s.reshape(-1).astype(jnp.float32), (0, pad))
        rows = (n + pad) // lane
        x2 = x_flat.reshape(rows, lane)
        y2 = y_flat.reshape(rows, lane)

    # Row-tile size: multiple of 8, capped so one block stays ~2 MiB of f32.
    cap = max(8, (_MAX_BLOCK_ELEMS // lane) // 8 * 8)
    tile_rows = min(tile_rows, cap, _round_up(rows, 8))
    tile_rows = _round_up(max(tile_rows, 8), 8)

    tiles_total = -(-rows // tile_rows)
    num_parts = max(1, min(num_parts, tiles_total))
    tiles_per_part = -(-tiles_total // num_parts)
    has_tail = (rows % tile_rows != 0) or (num_parts * tiles_per_part != tiles_total)

    if num_parts * tiles_per_part > tiles_total:
        # Some grid steps of the last part have no real tile: clamp the DMA to
        # the last valid block; their contribution is masked to zero in-kernel.
        def in_map(i, j, _tpp=tiles_per_part, _last=tiles_total - 1):
            return (jnp.minimum(i * _tpp + j, _last), 0)
    else:
        def in_map(i, j, _tpp=tiles_per_part):
            return (i * _tpp + j, 0)

    kernel = functools.partial(
        _binary_log_loss_kernel,
        tile_rows=tile_rows, lane=lane, tiles_per_part=tiles_per_part,
        rows=rows, has_tail=has_tail)

    out_shape = jax.ShapeDtypeStruct((num_parts * 8, lane), jnp.float32)
    cost = pl.CostEstimate(
        flops=6 * x2.size,
        transcendentals=2 * x2.size,
        bytes_accessed=int(x2.nbytes) + int(y2.nbytes) + num_parts * 8 * lane * 4)

    partials = pl.pallas_call(
        kernel,
        out_shape=out_shape,
        grid_spec=pltpu.PrefetchScalarGridSpec(
            num_scalar_prefetch=0,
            grid=(num_parts, tiles_per_part),
            in_specs=[
                pl.BlockSpec((tile_rows, lane), in_map),
                pl.BlockSpec((tile_rows, lane), in_map),
            ],
            out_specs=pl.BlockSpec((8, lane), lambda i, j: (i, 0)),
        ),
        compiler_params=pltpu.CompilerParams(
            dimension_semantics=("parallel", "arbitrary"),
        ),
        cost_estimate=cost,
    )(x2, y2)

    # Final tiny cross-lane reduce + mean scaling, once, in plain JAX.
    return jnp.sum(partials) * jnp.float32(1.0 / n)


def binary_log_loss_ref(out_prod, y_s):
    x = out_prod.astype(jnp.float32)
    y = y_s.astype(jnp.float32)
    ls = jax.nn.log_sigmoid
    return jnp.mean(-y * ls(x) - (1.0 - y) * ls(-x))


if __name__ == "__main__":
    key = jax.random.PRNGKey(0)
    k1, k2, k3, k4, k5, k6 = jax.random.split(key, 6)

    # (batch, seq, hidden) logits + binary targets, matching the module's usage.
    out_prod = jax.random.normal(k1, (2, 8, 256), dtype=jnp.float32) * 2.0
    y_s = jax.random.bernoulli(k2, 0.5, (2, 8, 256)).astype(jnp.float32)
    loss = jax.block_until_ready(binary_log_loss(out_prod, y_s))
    ref = binary_log_loss_ref(out_prod, y_s)
    assert jnp.allclose(loss, ref, rtol=1e-5, atol=1e-5), (loss, ref)

    # Ragged shape: exercises the "last dim as lane" no-copy path + row-tail mask.
    xo = jax.random.normal(k3, (3, 7, 19), dtype=jnp.float32) * 2.0
    yo = jax.random.bernoulli(k4, 0.5, (3, 7, 19)).astype(jnp.float32)
    loss_o = jax.block_until_ready(binary_log_loss(xo, yo))
    ref_o = binary_log_loss_ref(xo, yo)
    assert jnp.allclose(loss_o, ref_o, rtol=1e-5, atol=1e-5), (loss_o, ref_o)

    # Multi-step accumulation, partial last tile, forced uneven two-part split.
    xm = jax.random.normal(k5, (4, 37, 256), dtype=jnp.float32) * 2.0
    ym = jax.random.bernoulli(k6, 0.5, (4, 37, 256)).astype(jnp.float32)
    loss_m = jax.block_until_ready(binary_log_loss(xm, ym, tile_rows=8, num_parts=2))
    ref_m = binary_log_loss_ref(xm, ym)
    assert jnp.allclose(loss_m, ref_m, rtol=1e-5, atol=1e-5), (loss_m, ref_m)

    print("KERNEL_OK")
</pallas_src>

<mosaic_0001>
module attributes {stable_mosaic.version = 11 : i64} {
  func.func @_binary_log_loss_kernel(%arg0: i32, %arg1: i32, %arg2: memref<16x256xf32, #tpu.memory_space<vmem>>, %arg3: memref<16x256xf32, #tpu.memory_space<vmem>>, %arg4: memref<8x256xf32, #tpu.memory_space<vmem>>) attributes {dimension_semantics = [#tpu.dimension_semantics<parallel>, #tpu.dimension_semantics<arbitrary>], iteration_bounds = array<i64: 1, 1>, scalar_prefetch = 0 : i64, scratch_operands = 0 : i64, tpu.core_type = #tpu.core_type<tc>, window_params = [{transform_indices = @transform_0, window_bounds = array<i64: 16, 256>}, {transform_indices = @transform_1, window_bounds = array<i64: 16, 256>}, {transform_indices = @transform_2, window_bounds = array<i64: 8, 256>}]} {
    %c0_i32 = arith.constant 0 : i32
    %0 = arith.cmpi eq, %arg1, %c0_i32 : i32
    %1 = arith.extui %0 : i1 to i32
    %c0_i32_0 = arith.constant 0 : i32
    %2 = arith.cmpi ne, %1, %c0_i32_0 : i32
    scf.if %2 {
      %cst_10 = arith.constant 0.000000e+00 : f32
      %20 = vector.broadcast %cst_10 : f32 to vector<8x256xf32>
      %c0_11 = arith.constant 0 : index
      %c0_12 = arith.constant 0 : index
      %21 = vector.load %arg4[%c0_11, %c0_12] : memref<8x256xf32, #tpu.memory_space<vmem>>, vector<8x256xf32>
      tpu.vector_store %arg4[%c0_11, %c0_12], %20 {strides = array<i32>} : memref<8x256xf32, #tpu.memory_space<vmem>>, vector<8x256xf32>,
    } else {
    }
    %c0 = arith.constant 0 : index
    %c0_1 = arith.constant 0 : index
    %3 = vector.load %arg2[%c0, %c0_1] : memref<16x256xf32, #tpu.memory_space<vmem>>, vector<16x256xf32>
    %c0_2 = arith.constant 0 : index
    %c0_3 = arith.constant 0 : index
    %4 = vector.load %arg3[%c0_2, %c0_3] : memref<16x256xf32, #tpu.memory_space<vmem>>, vector<16x256xf32>
    %cst = arith.constant 0.000000e+00 : f32
    %5 = vector.broadcast %cst : f32 to vector<16x256xf32>
    %6 = arith.maximumf %3, %5 : vector<16x256xf32>
    %7 = arith.mulf %3, %4 : vector<16x256xf32>
    %8 = arith.subf %6, %7 : vector<16x256xf32>
    %9 = math.absf %3 : vector<16x256xf32>
    %cst_4 = arith.constant 0.000000e+00 : f32
    %10 = vector.broadcast %cst_4 : f32 to vector<16x256xf32>
    %11 = arith.subf %10, %9 : vector<16x256xf32>
    %12 = math.exp %11 : vector<16x256xf32>
    %13 = math.log1p %12 : vector<16x256xf32>
    %14 = arith.addf %8, %13 : vector<16x256xf32>
    %c0_5 = arith.constant 0 : index
    %c0_6 = arith.constant 0 : index
    %15 = vector.load %arg4[%c0_5, %c0_6] : memref<8x256xf32, #tpu.memory_space<vmem>>, vector<8x256xf32>
    %16 = vector.shape_cast %14 : vector<16x256xf32> to vector<2x8x256xf32>
    %cst_7 = arith.constant dense<0.000000e+00> : vector<8x256xf32>
    %17 = vector.multi_reduction <add>, %16, %cst_7 [0] : vector<2x8x256xf32> to vector<8x256xf32>
    %18 = arith.addf %15, %17 : vector<8x256xf32>
    %c0_8 = arith.constant 0 : index
    %c0_9 = arith.constant 0 : index
    %19 = vector.load %arg4[%c0_8, %c0_9] : memref<8x256xf32, #tpu.memory_space<vmem>>, vector<8x256xf32>
    tpu.vector_store %arg4[%c0_8, %c0_9], %18 {strides = array<i32>} : memref<8x256xf32, #tpu.memory_space<vmem>>, vector<8x256xf32>,
    return
  }
  func.func @transform_0(%arg0: i32, %arg1: i32) -> (i32, i32) {
    %c1_i32 = arith.constant 1 : i32
    %0 = arith.muli %arg0, %c1_i32 : i32
    %1 = arith.addi %0, %arg1 : i32
    %c0_i32 = arith.constant 0 : i32
    %c0_i32_0 = arith.constant 0 : i32
    return %1, %c0_i32 : i32, i32
  }
  func.func @transform_1(%arg0: i32, %arg1: i32) -> (i32, i32) {
    %c1_i32 = arith.constant 1 : i32
    %0 = arith.muli %arg0, %c1_i32 : i32
    %1 = arith.addi %0, %arg1 : i32
    %c0_i32 = arith.constant 0 : i32
    %c0_i32_0 = arith.constant 0 : i32
    return %1, %c0_i32 : i32, i32
  }
  func.func @transform_2(%arg0: i32, %arg1: i32) -> (i32, i32) {
    %c0_i32 = arith.constant 0 : i32
    %c0_i32_0 = arith.constant 0 : i32
    return %arg0, %c0_i32 : i32, i32
  }
}

</mosaic_0001>

<bundles_post_ra>
// kernel: tpu_custom_call.1
= control target key start
LH: loop header
LB: loop body
LE: loop exit
PB: predicated region body
PF: predicated region fallthrough
CT: control target
= control target key end

     0   :  { %7 = vsyncpa [#allocation3], 0  ;;  %s311_s0 = inlined_call_operand.hbm [shape: f32[16,256], index: 0, kind: input, shape index: {}]   ;;  %s312_s1 = inlined_call_operand.hbm [shape: f32[16,256], index: 1, kind: input, shape index: {}]   ;;  %s313_s2 = inlined_call_operand.hbm [shape: f32[8,256], index: 2, kind: output, shape index: {}]  }
   0x1   :  { %8 = vsyncpa [#allocation6], 0 }
   0x2   :  { %9 = vsyncpa [#allocation4], 0  ;;  %s19_s11 = sshll.u32 %s311_s0, 4  ;;  %s266_s12 = smov [#allocation2]   ;;  %s20_s11 = int_to_ptr.hbm [resolvable:$true] %s19_s11 }
   0x3   :  { %s21_s13 = sshll.u32 %s266_s12, 4  ;;  %s37_s16 = sshll.u32 %s312_s1, 4  ;;  %s22_s13 = int_to_ptr.vmem [resolvable:$true] %s21_s13  ;;  %s38_s16 = int_to_ptr.hbm [resolvable:$true] %s37_s16 }
   0x4   :  { %s267_s17 = smov 256   ;;  %s268_s18 = smov 16  }
   0x5   :  { %27 = dma.hbm_to_vmem [thread:$0]  %s20_s11, 512, %s22_s13, [#allocation3], %s267_s17, %s267_s17, %s268_s18  }
   0x6   :  { %s269_s19 = smov [#allocation5]  }
   0x7   :  { %s39_s20 = sshll.u32 %s269_s19, 4  ;;  %s40_s20 = int_to_ptr.vmem [resolvable:$true] %s39_s20 }
   0x8   :  { %45 = dma.hbm_to_vmem [thread:$0]  %s38_s16, 512, %s40_s20, [#allocation6], %s267_s17, %s267_s17, %s268_s18  }
   0x9   :  { %260 = dma.done.wait [#allocation3], 512  }
   0xa   :  { %261 = vsyncadd [#allocation3], 4294966784 }
   0xb   :  { %262 = dma.done.wait [#allocation6], 512  }
   0xc   :  { %263 = vsyncadd [#allocation6], 4294966784  ;;  %v64_v0 = vld [vmem:[#allocation2] sm:$0xff]  ;;  %v66_v1 = vld [vmem:[#allocation2 + $0x10] sm:$0xff]  ;;  %s270_s0 = smov [#allocation7]   ;;  %s155_s23 = sshll.u32 %s313_s2, 4  ;;  %s156_s23 = int_to_ptr.hbm [resolvable:$true] %s155_s23 }
   0xd   :  { %v84_v2 = vand.u32 2147483647, %v64_v0  ;;  %v292_v3 = vld [vmem:[#allocation2 + $0x8] sm:$0xff]  ;;  %v86_v4 = vand.u32 2147483647, %v66_v1  ;;  %v294_v5 = vld [vmem:[#allocation2 + $0x18] sm:$0xff] }
   0xe   :  { %v85_v8 = vand.u32 2147483647, %v292_v3  ;;  %v87_v10 = vand.u32 2147483647, %v294_v5  ;;  %v68_v17 = vld [vmem:[#allocation5] sm:$0xff]  ;;  %v70_v19 = vld [vmem:[#allocation5 + $0x10] sm:$0xff] }
   0xf   :  { %v88_v6 = vsub.f32 0.0, %v84_v2  ;;  %v90_v7 = vsub.f32 0.0, %v86_v4  ;;  %v72_v25 = vmax.f32 %v64_v0, 0.0  ;;  %v74_v26 = vmax.f32 %v66_v1, 0.0  ;;  %v69_v31 = vld [vmem:[#allocation5 + $0x8] sm:$0xff]  ;;  %v71_v35 = vld [vmem:[#allocation5 + $0x18] sm:$0xff] }
  0x10   :  { %v89_v12 = vsub.f32 0.0, %v85_v8  ;;  %v91_v13 = vsub.f32 0.0, %v87_v10  ;;  %v76_v27 = vmul.f32 %v68_v17, %v64_v0  ;;  %v78_v29 = vmul.f32 %v70_v19, %v66_v1  ;;  %s153_s1 = sshll.u32 %s270_s0, 4  ;;  %s154_s1 = int_to_ptr.vmem [resolvable:$true] %s153_s1 }
  0x11   :  { %v92_v9 = vmul.f32 1.442695, %v88_v6  ;;  %v96_v11 = vmul.f32 1.442695, %v90_v7  ;;  %v73_v39 = vmax.f32 %v292_v3, 0.0  ;;  %v75_v41 = vmax.f32 %v294_v5, 0.0 }
  0x12   :  { %v94_v14 = vmul.f32 1.442695, %v89_v12  ;;  %v98_v15 = vmul.f32 1.442695, %v91_v13  ;;  %v77_v42 = vmul.f32 %v69_v31, %v292_v3  ;;  %v79_v45 = vmul.f32 %v71_v35, %v294_v5 }
  0x13   :  { %172 = vpow2.f32 %v92_v9  ;;  %v80_v49 = vsub.f32 %v72_v25, %v76_v27  ;;  %v82_v54 = vsub.f32 %v74_v26, %v78_v29 }
  0x14   :  { %174 = vpow2.f32 %v96_v11  ;;  %v81_v57 = vsub.f32 %v73_v39, %v77_v42  ;;  %v83_v61 = vsub.f32 %v75_v41, %v79_v45 }
  0x15   :  { %176 = vpow2.f32 %v94_v14 }
  0x16   :  { %178 = vpow2.f32 %v98_v15 }
  0x19   :  { %v173_v16 = vpop.eup %172 }
  0x1a   :  { %v175_v18 = vpop.eup %174  ;;  %v100_v20 = vadd.f32 1.0, %v173_v16  ;;  %v103_v21 = vmul.f32 -0.5, %v173_v16  ;;  %v106_v33 = vand.u32 2147483647, %v173_v16 }
  0x1b   :  { %v118_v22 = vadd.f32 1.0, %v175_v18  ;;  %v121_v23 = vmul.f32 -0.5, %v175_v18  ;;  %v177_v24 = vpop.eup %176  ;;  %v124_v38 = vand.u32 2147483647, %v175_v18 }
  0x1c   :  { %180 = vlog2.f32 %v100_v20  ;;  %v179_v28 = vpop.eup %178  ;;  %v104_v30 = vadd.f32 1.0, %v103_v21  ;;  %v109_v32 = vadd.f32 1.0, %v177_v24  ;;  %v112_v36 = vmul.f32 -0.5, %v177_v24 }
  0x1d   :  { %182 = vlog2.f32 %v118_v22  ;;  %v122_v34 = vadd.f32 1.0, %v121_v23  ;;  %v127_v37 = vadd.f32 1.0, %v179_v28  ;;  %v130_v40 = vmul.f32 -0.5, %v179_v28 }
  0x1e   :  { %184 = vlog2.f32 %v109_v32  ;;  %v113_v43 = vadd.f32 1.0, %v112_v36  ;;  %v105_v44 = vmul.f32 %v173_v16, %v104_v30  ;;  %v115_v46 = vand.u32 2147483647, %v177_v24 }
  0x1f   :  { %186 = vlog2.f32 %v127_v37  ;;  %v131_v47 = vadd.f32 1.0, %v130_v40  ;;  %vm302_vm0 = vcmp.lt.f32.partialorder %v106_v33, 0.0004427343  ;;  %v123_v51 = vmul.f32 %v175_v18, %v122_v34 }
  0x20   :  { %v133_v52 = vand.u32 2147483647, %v179_v28  ;;  %vm125_vm1 = vcmp.lt.f32.partialorder %v124_v38, 0.0004427343  ;;  %v114_v58 = vmul.f32 %v177_v24, %v113_v43  ;;  %vm116_vm2 = vcmp.lt.f32.partialorder %v115_v46, 0.0004427343 }
  0x21   :  { %v132_v62 = vmul.f32 %v179_v28, %v131_v47 }
  0x22   :  { %v181_v48 = vpop.eup %180  ;;  %vm134_vm3 = vcmp.lt.f32.partialorder %v133_v52, 0.0004427343 }
  0x23   :  { %v183_v53 = vpop.eup %182  ;;  %v102_v55 = vmul.f32 0.6931472, %v181_v48 }
  0x24   :  { %v120_v56 = vmul.f32 0.6931472, %v183_v53  ;;  %v185_v59 = vpop.eup %184 }
  0x25   :  { %v108_v60 = vsel %vm302_vm0, %v105_v44, %v102_v55  ;;  %v187_v63 = vpop.eup %186  ;;  %v111_v2 = vmul.f32 0.6931472, %v185_v59 }
  0x26   :  { %v126_v0 = vsel %vm125_vm1, %v123_v51, %v120_v56  ;;  %v136_v1 = vadd.f32 %v108_v60, %v80_v49  ;;  %v129_v4 = vmul.f32 0.6931472, %v187_v63 }
  0x27   :  { %v138_v3 = vadd.f32 %v126_v0, %v82_v54  ;;  %v117_v5 = vsel %vm116_vm2, %v114_v58, %v111_v2 }
  0x28   :  { %v135_v7 = vsel %vm134_vm3, %v132_v62, %v129_v4  ;;  %v137_v8 = vadd.f32 %v117_v5, %v81_v57 }
  0x29   :  { %v142_v6 = vadd.f32 %v138_v3, %v136_v1  ;;  %v139_v9 = vadd.f32 %v135_v7, %v83_v61 }
  0x2b   :  { %v143_v10 = vadd.f32 %v139_v9, %v137_v8  ;;  %146 = vst [vmem:[#allocation7] sm:$0xff] %v142_v6 }
  0x2d   :  { %147 = vst [vmem:[#allocation7 + $0x8] sm:$0xff] %v143_v10 }
  0x2e   :  { %158 = dma.vmem_to_hbm [thread:$0]  %s154_s1, 256, %s156_s23, [#allocation4]  }
  0x2f   :  { %264 = dma.done.wait [#allocation4], 256  }
  0x30   :  { %265 = vsyncadd [#allocation4], 4294967040 }
  0x31   :  { %163 = vsyncpa [#allocation3], 1 }
  0x32   :  { %164 = vsyncpa [#allocation6], 1 }
  0x33   :  { %165 = vsyncpa [#allocation4], 1 }

</bundles_post_ra>
